<compile_context>
chip_gen: v5e
topology: v5e:2x2
jax: 0.10.0
libtpu: 0.0.40
codegen_flags: <defaults>
</compile_context>

<pallas_src>
import functools

import jax
import jax.numpy as jnp
from jax.experimental import pallas as pl
from jax.experimental.pallas import tpu as pltpu


def _ntd_loss_kernel(logits_ref, targets_ref, dg_ref, out_ref, *, tau, beta, b_total):
    # Blocks arrive in natural (TB, C) layout (fully contiguous HBM DMA).
    tb, C = logits_ref.shape

    # Single XLU transpose per operand -> lane-dense (C, TB): classes on
    # sublanes, batch columns on lanes.
    lt = jnp.transpose(logits_ref[...].astype(jnp.float32))     # (C, TB)
    dt = jnp.transpose(dg_ref[...].astype(jnp.float32))         # (C, TB)
    tgt = targets_ref[...]                                       # (1, TB) int32

    cls_ids = jax.lax.broadcasted_iota(jnp.int32, (C, tb), 0)
    is_tgt = cls_ids == tgt                                      # one True per valid col

    # Ragged last tile: mask columns past the true batch size.  Select (not
    # multiply), so NaN/Inf garbage from out-of-bounds rows never reaches the sum.
    col_ids = jax.lax.broadcasted_iota(jnp.int32, (1, tb), 1)
    valid = (pl.program_id(0) * tb + col_ids) < b_total          # (1, TB)

    # ---- CrossEntropyLoss per column (class reduction = sublane axis) ----
    m = jnp.max(lt, axis=0, keepdims=True)
    lse = m + jnp.log(jnp.sum(jnp.exp(lt - m), axis=0, keepdims=True))
    tgt_logit = jnp.sum(jnp.where(is_tgt, lt, 0.0), axis=0, keepdims=True)
    ce_cols = lse - tgt_logit                                    # (1, TB)

    # ---- Not-true distillation KL per column (algebraically folded) ----
    # refine_as_not_true drops the target column; masking it to -1e30 before the
    # tempered softmaxes is equivalent (its exp underflows to exactly 0, so it
    # contributes nothing to either sum).
    NEG = jnp.float32(-1e30)
    inv_tau = jnp.float32(1.0 / tau)
    z_s = jnp.where(is_tgt, NEG, lt * inv_tau)                   # student (grad path)
    z_t = jnp.where(is_tgt, NEG, dt * inv_tau)                   # teacher (no-grad)

    m_s = jnp.max(z_s, axis=0, keepdims=True)
    sh_s = z_s - m_s
    sum_s = jnp.sum(jnp.exp(sh_s), axis=0, keepdims=True)

    m_t = jnp.max(z_t, axis=0, keepdims=True)
    sh_t = z_t - m_t
    e_t = jnp.exp(sh_t)
    sum_t = jnp.sum(e_t, axis=0, keepdims=True)

    # KL(q || p) over not-true classes, folded:
    #   (1/sum_t) * sum_c e_t_c*(sh_t_c - sh_s_c) + log(sum_s) - log(sum_t)
    kl_cols = (jnp.sum(e_t * (sh_t - sh_s), axis=0, keepdims=True) / sum_t
               + jnp.log(sum_s) - jnp.log(sum_t))                # (1, TB)

    # One fused cross-lane reduction per tile.
    per_col = ce_cols + jnp.float32(beta) * kl_cols
    total = jnp.sum(jnp.where(valid, per_col, 0.0))

    # Lane-dense partial-sum block (1, 1, 128); final sum + 1/B in plain JAX.
    out_ref[...] = jnp.full((1, 1, 128), total, dtype=jnp.float32)


def ntd_loss(logits, targets, dg_logits, *, num_classes=10, tau=3.0, beta=1.0,
             block_b=8192):
    """Pallas implementation of NTD_Loss.forward (CE + beta * not-true KL)."""
    B, C = logits.shape
    assert C == num_classes

    # Batch tile (the lane axis after the in-kernel transpose).  No host-side
    # transpose or padding: blocks are contiguous (TB, C) slices of the natural
    # layout; the ragged last tile is masked in-kernel.  For B > 128 the tile is
    # capped so the grid has >= 2 steps (both v7x TensorCores get batch work).
    if B <= 128:
        tb = B                                       # single full-array block
    else:
        half = (pl.cdiv(B, 2) // 128) * 128          # largest mult-of-128 <= ceil(B/2)
        tb = max(128, min(block_b, half if half else 128))
    g = pl.cdiv(B, tb)

    tg = targets.reshape(1, B).astype(jnp.int32)     # tiny; keeps targets 2-D

    kernel = functools.partial(_ntd_loss_kernel, tau=float(tau), beta=float(beta),
                               b_total=B)
    itemsize = jnp.dtype(logits.dtype).itemsize      # bf16 inputs pass straight through
    cost = pl.CostEstimate(
        flops=int(30 * B * C),
        transcendentals=int(3 * B * C + 5 * B),
        bytes_accessed=int(2 * B * C * itemsize + 4 * B + 4 * 128 * g),
    )

    partials = pl.pallas_call(
        kernel,
        out_shape=jax.ShapeDtypeStruct((g, 1, 128), jnp.float32),
        grid=(g,),
        in_specs=[
            pl.BlockSpec((tb, C), lambda i: (i, 0)),   # logits   (B, C), contiguous DMA
            pl.BlockSpec((1, tb), lambda i: (0, i)),   # targets  (1, B)
            pl.BlockSpec((tb, C), lambda i: (i, 0)),   # dg       (B, C), contiguous DMA
        ],
        out_specs=pl.BlockSpec((1, 1, 128), lambda i: (i, 0, 0)),
        compiler_params=pltpu.CompilerParams(
            dimension_semantics=("parallel",)),        # batch split across TCs on v7x
        cost_estimate=cost,
    )(logits, tg, dg_logits)

    # Tiny cross-tile reduce; normalize by the GLOBAL batch size.
    return jnp.sum(partials[:, 0, 0]) / B


def _ref_loss(logits, targets, dg_logits, num_classes=10, tau=3.0, beta=1.0):
    """Pure-JAX reference mirroring the PyTorch module (non-jitted)."""
    B = logits.shape[0]
    logp = jax.nn.log_softmax(logits, axis=1)
    ce = -jnp.mean(jnp.take_along_axis(logp, targets[:, None], axis=1))
    mask = jnp.arange(num_classes)[None, :] != targets[:, None]
    nt_logits = logits[mask].reshape(B, num_classes - 1)
    nt_dg = dg_logits[mask].reshape(B, num_classes - 1)
    log_p = jax.nn.log_softmax(nt_logits / tau, axis=1)
    q = jax.nn.softmax(nt_dg / tau, axis=1)
    kl = jnp.sum(q * (jnp.log(q) - log_p)) / B
    return ce + beta * kl


if __name__ == "__main__":
    C = 10
    k1, k2, k3, k4, k5, k6 = jax.random.split(jax.random.PRNGKey(0), 6)

    # Case 1: small batch (single full-array block, B on lanes after transpose).
    B = 8
    logits = jax.random.normal(k1, (B, C), dtype=jnp.float32)
    dg_logits = jax.random.normal(k2, (B, C), dtype=jnp.float32)
    targets = jax.random.randint(k3, (B,), 0, C, dtype=jnp.int32)

    loss = ntd_loss(logits, targets, dg_logits, num_classes=C, tau=3.0, beta=1.0)
    loss = jax.block_until_ready(loss)
    ref = _ref_loss(logits, targets, dg_logits, num_classes=C, tau=3.0, beta=1.0)
    assert jnp.allclose(loss, ref, rtol=1e-3, atol=1e-4), (loss, ref)

    # Case 2: multi-tile grid + ragged last tile + non-default tau/beta.
    B2 = 300
    logits2 = jax.random.normal(k4, (B2, C), dtype=jnp.float32)
    dg2 = jax.random.normal(k5, (B2, C), dtype=jnp.float32)
    targets2 = jax.random.randint(k6, (B2,), 0, C, dtype=jnp.int32)

    loss2 = ntd_loss(logits2, targets2, dg2, num_classes=C, tau=2.0, beta=0.7)
    loss2 = jax.block_until_ready(loss2)
    ref2 = _ref_loss(logits2, targets2, dg2, num_classes=C, tau=2.0, beta=0.7)
    assert jnp.allclose(loss2, ref2, rtol=1e-3, atol=1e-4), (loss2, ref2)

    print("KERNEL_OK")
</pallas_src>

<mosaic_0001>
module attributes {stable_mosaic.version = 11 : i64} {
  func.func @_ntd_loss_kernel(%arg0: i32, %arg1: memref<8x10xf32, #tpu.memory_space<vmem>>, %arg2: memref<1x8xi32, #tpu.memory_space<vmem>>, %arg3: memref<8x10xf32, #tpu.memory_space<vmem>>, %arg4: memref<1x1x128xf32, #tpu.memory_space<vmem>>) attributes {dimension_semantics = [#tpu.dimension_semantics<parallel>], iteration_bounds = array<i64: 1>, scalar_prefetch = 0 : i64, scratch_operands = 0 : i64, tpu.core_type = #tpu.core_type<tc>, window_params = [{transform_indices = @transform_0, window_bounds = array<i64: 8, 10>}, {transform_indices = @transform_1, window_bounds = array<i64: 1, 8>}, {transform_indices = @transform_2, window_bounds = array<i64: 8, 10>}, {transform_indices = @transform_3, window_bounds = array<i64: 1, 1, 128>}]} {
    %c0 = arith.constant 0 : index
    %c0_0 = arith.constant 0 : index
    %0 = vector.load %arg1[%c0, %c0_0] : memref<8x10xf32, #tpu.memory_space<vmem>>, vector<8x10xf32>
    %1 = tpu.transpose %0, [1, 0] : vector<8x10xf32> -> vector<10x8xf32>
    %c0_1 = arith.constant 0 : index
    %c0_2 = arith.constant 0 : index
    %2 = vector.load %arg3[%c0_1, %c0_2] : memref<8x10xf32, #tpu.memory_space<vmem>>, vector<8x10xf32>
    %3 = tpu.transpose %2, [1, 0] : vector<8x10xf32> -> vector<10x8xf32>
    %c0_3 = arith.constant 0 : index
    %c0_4 = arith.constant 0 : index
    %4 = vector.load %arg2[%c0_3, %c0_4] : memref<1x8xi32, #tpu.memory_space<vmem>>, vector<1x8xi32>
    %5 = tpu.iota {dimensions = array<i32: 0>} : vector<10x8xi32>
    %6 = vector.broadcast %4 : vector<1x8xi32> to vector<10x8xi32>
    %7 = arith.cmpi eq, %5, %6 : vector<10x8xi32>
    %8 = tpu.iota {dimensions = array<i32: 1>} : vector<1x8xi32>
    %c8_i32 = arith.constant 8 : i32
    %9 = arith.muli %arg0, %c8_i32 : i32
    %10 = vector.broadcast %9 : i32 to vector<1x8xi32>
    %11 = arith.addi %10, %8 : vector<1x8xi32>
    %c8_i32_5 = arith.constant 8 : i32
    %12 = vector.broadcast %c8_i32_5 : i32 to vector<1x8xi32>
    %13 = arith.cmpi slt, %11, %12 : vector<1x8xi32>
    %cst = arith.constant dense<0xFF800000> : vector<8xf32>
    %14 = vector.multi_reduction <maximumf>, %1, %cst [0] : vector<10x8xf32> to vector<8xf32>
    %15 = vector.shape_cast %14 : vector<8xf32> to vector<1x8xf32>
    %16 = vector.broadcast %15 : vector<1x8xf32> to vector<10x8xf32>
    %17 = arith.subf %1, %16 : vector<10x8xf32>
    %18 = math.exp %17 : vector<10x8xf32>
    %cst_6 = arith.constant dense<0.000000e+00> : vector<8xf32>
    %19 = vector.multi_reduction <add>, %18, %cst_6 [0] : vector<10x8xf32> to vector<8xf32>
    %20 = vector.shape_cast %19 : vector<8xf32> to vector<1x8xf32>
    %21 = math.log %20 : vector<1x8xf32>
    %22 = arith.addf %15, %21 : vector<1x8xf32>
    %cst_7 = arith.constant 0.000000e+00 : f32
    %23 = vector.broadcast %cst_7 : f32 to vector<10x8xf32>
    %24 = arith.select %7, %1, %23 : vector<10x8xi1>, vector<10x8xf32>
    %cst_8 = arith.constant dense<0.000000e+00> : vector<8xf32>
    %25 = vector.multi_reduction <add>, %24, %cst_8 [0] : vector<10x8xf32> to vector<8xf32>
    %26 = vector.shape_cast %25 : vector<8xf32> to vector<1x8xf32>
    %27 = arith.subf %22, %26 : vector<1x8xf32>
    %cst_9 = arith.constant 0.333333343 : f32
    %28 = vector.broadcast %cst_9 : f32 to vector<10x8xf32>
    %29 = arith.mulf %1, %28 : vector<10x8xf32>
    %cst_10 = arith.constant -1.000000e+30 : f32
    %30 = vector.broadcast %cst_10 : f32 to vector<10x8xf32>
    %31 = arith.select %7, %30, %29 : vector<10x8xi1>, vector<10x8xf32>
    %cst_11 = arith.constant 0.333333343 : f32
    %32 = vector.broadcast %cst_11 : f32 to vector<10x8xf32>
    %33 = arith.mulf %3, %32 : vector<10x8xf32>
    %cst_12 = arith.constant -1.000000e+30 : f32
    %34 = vector.broadcast %cst_12 : f32 to vector<10x8xf32>
    %35 = arith.select %7, %34, %33 : vector<10x8xi1>, vector<10x8xf32>
    %cst_13 = arith.constant dense<0xFF800000> : vector<8xf32>
    %36 = vector.multi_reduction <maximumf>, %31, %cst_13 [0] : vector<10x8xf32> to vector<8xf32>
    %37 = vector.shape_cast %36 : vector<8xf32> to vector<1x8xf32>
    %38 = vector.broadcast %37 : vector<1x8xf32> to vector<10x8xf32>
    %39 = arith.subf %31, %38 : vector<10x8xf32>
    %40 = math.exp %39 : vector<10x8xf32>
    %cst_14 = arith.constant dense<0.000000e+00> : vector<8xf32>
    %41 = vector.multi_reduction <add>, %40, %cst_14 [0] : vector<10x8xf32> to vector<8xf32>
    %42 = vector.shape_cast %41 : vector<8xf32> to vector<1x8xf32>
    %cst_15 = arith.constant dense<0xFF800000> : vector<8xf32>
    %43 = vector.multi_reduction <maximumf>, %35, %cst_15 [0] : vector<10x8xf32> to vector<8xf32>
    %44 = vector.shape_cast %43 : vector<8xf32> to vector<1x8xf32>
    %45 = vector.broadcast %44 : vector<1x8xf32> to vector<10x8xf32>
    %46 = arith.subf %35, %45 : vector<10x8xf32>
    %47 = math.exp %46 : vector<10x8xf32>
    %cst_16 = arith.constant dense<0.000000e+00> : vector<8xf32>
    %48 = vector.multi_reduction <add>, %47, %cst_16 [0] : vector<10x8xf32> to vector<8xf32>
    %49 = vector.shape_cast %48 : vector<8xf32> to vector<1x8xf32>
    %50 = arith.subf %46, %39 : vector<10x8xf32>
    %51 = arith.mulf %47, %50 : vector<10x8xf32>
    %cst_17 = arith.constant dense<0.000000e+00> : vector<8xf32>
    %52 = vector.multi_reduction <add>, %51, %cst_17 [0] : vector<10x8xf32> to vector<8xf32>
    %53 = vector.shape_cast %52 : vector<8xf32> to vector<1x8xf32>
    %54 = arith.divf %53, %49 : vector<1x8xf32>
    %55 = math.log %42 : vector<1x8xf32>
    %56 = arith.addf %54, %55 : vector<1x8xf32>
    %57 = math.log %49 : vector<1x8xf32>
    %58 = arith.subf %56, %57 : vector<1x8xf32>
    %cst_18 = arith.constant 1.000000e+00 : f32
    %59 = vector.broadcast %cst_18 : f32 to vector<1x8xf32>
    %60 = arith.mulf %59, %58 : vector<1x8xf32>
    %61 = arith.addf %27, %60 : vector<1x8xf32>
    %cst_19 = arith.constant 0.000000e+00 : f32
    %62 = vector.broadcast %cst_19 : f32 to vector<1x8xf32>
    %63 = arith.select %13, %61, %62 : vector<1x8xi1>, vector<1x8xf32>
    %64 = vector.shape_cast %63 : vector<1x8xf32> to vector<1x1x8xf32>
    %cst_20 = arith.constant dense<0.000000e+00> : vector<1xf32>
    %65 = vector.multi_reduction <add>, %64, %cst_20 [1, 2] : vector<1x1x8xf32> to vector<1xf32>
    %66 = vector.shape_cast %65 : vector<1xf32> to vector<1x1x1xf32>
    %67 = vector.extract %66[0, 0, 0] : f32 from vector<1x1x1xf32>
    %68 = vector.broadcast %67 : f32 to vector<1x1x128xf32>
    %c0_21 = arith.constant 0 : index
    %c0_22 = arith.constant 0 : index
    %c0_23 = arith.constant 0 : index
    %69 = vector.load %arg4[%c0_21, %c0_22, %c0_23] : memref<1x1x128xf32, #tpu.memory_space<vmem>>, vector<1x1x128xf32>
    tpu.vector_store %arg4[%c0_21, %c0_22, %c0_23], %68 {strides = array<i32>} : memref<1x1x128xf32, #tpu.memory_space<vmem>>, vector<1x1x128xf32>,
    return
  }
  func.func @transform_0(%arg0: i32) -> (i32, i32) {
    %c0_i32 = arith.constant 0 : i32
    %c0_i32_0 = arith.constant 0 : i32
    return %arg0, %c0_i32 : i32, i32
  }
  func.func @transform_1(%arg0: i32) -> (i32, i32) {
    %c0_i32 = arith.constant 0 : i32
    %c0_i32_0 = arith.constant 0 : i32
    return %c0_i32, %arg0 : i32, i32
  }
  func.func @transform_2(%arg0: i32) -> (i32, i32) {
    %c0_i32 = arith.constant 0 : i32
    %c0_i32_0 = arith.constant 0 : i32
    return %arg0, %c0_i32 : i32, i32
  }
  func.func @transform_3(%arg0: i32) -> (i32, i32, i32) {
    %c0_i32 = arith.constant 0 : i32
    %c0_i32_0 = arith.constant 0 : i32
    %c0_i32_1 = arith.constant 0 : i32
    return %arg0, %c0_i32, %c0_i32_0 : i32, i32, i32
  }
}

</mosaic_0001>

<bundles_post_ra>
// kernel: tpu_custom_call.1
= control target key start
LH: loop header
LB: loop body
LE: loop exit
PB: predicated region body
PF: predicated region fallthrough
CT: control target
= control target key end

     0   :  { %8 = vsyncpa [#allocation3], 0  ;;  %s523_s0 = inlined_call_operand.hbm [shape: f32[8,10], index: 0, kind: input, shape index: {}]   ;;  %s524_s1 = inlined_call_operand.hbm [shape: s32[1,8], index: 1, kind: input, shape index: {}]   ;;  %s525_s2 = inlined_call_operand.hbm [shape: f32[8,10], index: 2, kind: input, shape index: {}]   ;;  %s526_s3 = inlined_call_operand.hbm [shape: f32[1,1,128], index: 3, kind: output, shape index: {}]  }
   0x1   :  { %9 = vsyncpa [#allocation6], 0  ;;  %s27_s14 = sshll.u32 %s524_s1, 4  ;;  %s28_s14 = int_to_ptr.hbm [resolvable:$true] %s27_s14 }
   0x2   :  { %10 = vsyncpa [#allocation4], 0  ;;  %s429_s15 = smov [#allocation5]   ;;  %s16_s19 = sshll.u32 %s523_s0, 4  ;;  %s17_s19 = int_to_ptr.hbm [resolvable:$true] %s16_s19 }
   0x3   :  { %s29_s16 = sshll.u32 %s429_s15, 4  ;;  %s430_s20 = smov [#allocation2]   ;;  %s30_s16 = int_to_ptr.vmem [resolvable:$true] %s29_s16 }
   0x4   :  { %32 = dma.hbm_to_vmem [thread:$0]  %s28_s14, 16, %s30_s16, [#allocation6]  }
   0x5   :  { %s18_s21 = sshll.u32 %s430_s20, 4  ;;  %s38_s24 = sshll.u32 %s525_s2, 4  ;;  %s19_s21 = int_to_ptr.vmem [resolvable:$true] %s18_s21  ;;  %s39_s24 = int_to_ptr.hbm [resolvable:$true] %s38_s24 }
   0x6   :  { %21 = dma.hbm_to_vmem [thread:$0]  %s17_s19, 128, %s19_s21, [#allocation3]  }
   0x7   :  { %s431_s1 = smov [#allocation7]  }
   0x8   :  { %s40_s25 = sshll.u32 %s431_s1, 4  ;;  %s41_s25 = int_to_ptr.vmem [resolvable:$true] %s40_s25 }
   0x9   :  { %43 = dma.hbm_to_vmem [thread:$0]  %s39_s24, 128, %s41_s25, [#allocation6]  }
   0xa   :  { %423 = dma.done.wait [#allocation3], 128  }
   0xb   :  { %424 = vsyncadd [#allocation3], 4294967168 }
   0xc   :  { %425 = dma.done.wait [#allocation6], 144  }
   0xd   :  { %426 = vsyncadd [#allocation6], 4294967152  ;;  %v89_v0 = vld [vmem:[#allocation7] sm:$0xff]  ;;  %v56_v1 = vld [vmem:[#allocation2] sm:$0xff]  ;;  %v123_v2 = vlaneseq  ;;  %vm135_vm2 = vcmask 64512   ;;  %vm137_vm3 = vcmask 58368  }
   0xe   :  { %90 = vxpose.xlu0.b32.start.end [1/1] (short) (narrow) %v89_v0, 16  ;;  %v465_v5 = vld [vmem:[#allocation5] ss:$0 sm:$0xff]  ;;  %vm268_vm9 = vcmask 57344   ;;  %s288_s26 = sshll.u32 %s526_s3, 4  ;;  %s432_s27 = smov [#allocation8]   ;;  %s289_s26 = int_to_ptr.hbm [resolvable:$true] %s288_s26 }
   0xf   :  { %v463_v4 = vshrl.u32 %v123_v2, 7  ;;  %s286_s28 = sshll.u32 %s432_s27, 4  ;;  %s287_s28 = int_to_ptr.vmem [resolvable:$true] %s286_s28 }
  0x11   :  { %v468_v6 = vadd.s32 8, %v463_v4  ;;  %vm127_vm0 = vcmp.eq.s32.totalorder %v463_v4, %v465_v5 }
  0x13   :  { %vm128_vm1 = vcmp.eq.s32.totalorder %v468_v6, %v465_v5 }
  0x1e   :  { %57 = vxpose.xlu0.b32.start.end [1/1] (short) (narrow) %v56_v1, 16 }
  0xb2   :  { %v106_v3 = vpop.trf.xlu0 }
  0xb3   :  { %v180_v7 = vmul.f32 0.33333334, %v106_v3 }
  0xb5   :  { %v182_v9 = vsel %vm127_vm0, -1e+30, %v180_v7 }
  0xb6   :  { %v208_v12 = vsel %vm135_vm2, %v182_v9, -inf }
  0xba   :  { %v107_v8 = vpop.trf.xlu0 }
  0xbb   :  { %v181_v10 = vmul.f32 0.33333334, %v107_v8 }
  0xbd   :  { %v183_v11 = vsel %vm128_vm1, -1e+30, %v181_v10 }
  0xbe   :  { %v209_v13 = vsel %vm137_vm3, %v183_v11, -inf }
  0xbf   :  { %v210_v14 = vmax.f32 %v208_v12, %v209_v13 }
  0xc1   :  { %v211_v15 = vrot.slane %v210_v14, 4 }
  0xc2   :  { %v482_v16 = vpop.trf.xlu0 }
  0xc3   :  { %v212_v17 = vmax.f32 %v210_v14, %v211_v15  ;;  %v176_v20 = vmul.f32 0.33333334, %v482_v16  ;;  %v136_v22 = vsel %vm135_vm2, %v482_v16, -inf  ;;  %v164_v14 = vsel %vm127_vm0, %v482_v16, 0.0 }
  0xc5   :  { %v213_v18 = vrot.slane %v212_v17, 2  ;;  %v178_v25 = vsel %vm127_vm0, -1e+30, %v176_v20 }
  0xc6   :  { %v184_v32 = vsel %vm135_vm2, %v178_v25, -inf }
  0xc7   :  { %v214_v19 = vmax.f32 %v212_v17, %v213_v18 }
  0xc9   :  { %v215_v21 = vrot.slane %v214_v19, 1 }
  0xca   :  { %v74_v23 = vpop.trf.xlu0 }
  0xcb   :  { %v216_v24 = vmax.f32 %v214_v19, %v215_v21  ;;  %v138_v26 = vsel %vm137_vm3, %v74_v23, -inf  ;;  %v177_v27 = vmul.f32 0.33333334, %v74_v23 }
  0xcc   :  { %v139_v28 = vmax.f32 %v136_v22, %v138_v26 }
  0xcd   :  { %v217_v29 = vsub.f32 %v182_v9, %v216_v24  ;;  %v218_v30 = vsub.f32 %v183_v11, %v216_v24  ;;  %v179_v31 = vsel %vm128_vm1, -1e+30, %v177_v27  ;;  %v165_v9 = vsel %vm128_vm1, %v74_v23, 0.0 }
  0xce   :  { %v140_v33 = vrot.slane %v139_v28, 4  ;;  %v185_v34 = vsel %vm137_vm3, %v179_v31, -inf  ;;  %v167_v19 = vsel %vm137_vm3, %v165_v9, 0.0 }
  0xcf   :  { %v219_v35 = vmul.f32 1.442695, %v217_v29  ;;  %v221_v36 = vmul.f32 1.442695, %v218_v30  ;;  %v186_v37 = vmax.f32 %v184_v32, %v185_v34 }
  0xd0   :  { %v141_v38 = vmax.f32 %v139_v28, %v140_v33 }
  0xd1   :  { %307 = vpow2.f32 %v219_v35  ;;  %v187_v39 = vrot.slane %v186_v37, 4 }
  0xd2   :  { %309 = vpow2.f32 %v221_v36  ;;  %v142_v40 = vrot.slane %v141_v38, 2 }
  0xd3   :  { %v188_v41 = vmax.f32 %v186_v37, %v187_v39 }
  0xd4   :  { %v143_v42 = vmax.f32 %v141_v38, %v142_v40 }
  0xd5   :  { %v189_v43 = vrot.slane %v188_v41, 2 }
  0xd6   :  { %v144_v44 = vrot.slane %v143_v42, 1 }
  0xd7   :  { %v308_v45 = vpop.eup %307  ;;  %v190_v46 = vmax.f32 %v188_v41, %v189_v43 }
  0xd8   :  { %v310_v47 = vpop.eup %309  ;;  %v223_v48 = vsel %vm135_vm2, %v308_v45, 0.0  ;;  %v497_v49 = vmax.f32 %v143_v42, %v144_v44 }
  0xd9   :  { %v224_v50 = vsel %vm137_vm3, %v310_v47, 0.0  ;;  %v191_v51 = vrot.slane %v190_v46, 1 }
  0xda   :  { %v225_v52 = vadd.f32 %v224_v50, %v223_v48  ;;  %v146_v53 = vsub.f32 %v482_v16, %v497_v49  ;;  %v147_v54 = vsub.f32 %v74_v23, %v497_v49  ;;  %v166_v23 = vsel %vm135_vm2, %v164_v14, 0.0 }
  0xdb   :  { %v192_v55 = vmax.f32 %v190_v46, %v191_v51  ;;  %v168_v26 = vadd.f32 %v167_v19, %v166_v23 }
  0xdc   :  { %v226_v56 = vrot.slane %v225_v52, 4  ;;  %v148_v57 = vmul.f32 1.442695, %v146_v53  ;;  %v150_v58 = vmul.f32 1.442695, %v147_v54 }
  0xdd   :  { %v193_v59 = vsub.f32 %v178_v25, %v192_v55  ;;  %v194_v60 = vsub.f32 %v179_v31, %v192_v55 }
  0xde   :  { %v227_v61 = vadd.f32 %v226_v56, %v225_v52  ;;  %311 = vpow2.f32 %v148_v57 }
  0xdf   :  { %313 = vpow2.f32 %v150_v58  ;;  %v195_v62 = vmul.f32 1.442695, %v193_v59  ;;  %v197_v63 = vmul.f32 1.442695, %v194_v60  ;;  %v232_v0 = vsub.f32 %v217_v29, %v193_v59 }
  0xe0   :  { %v228_v1 = vrot.slane %v227_v61, 2  ;;  %v233_v3 = vsub.f32 %v218_v30, %v194_v60  ;;  %v169_v30 = vrot.slane %v168_v26, 4 }
  0xe1   :  { %315 = vpow2.f32 %v195_v62  ;;  %v234_v7 = vmul.f32 %v308_v45, %v232_v0 }
  0xe2   :  { %v229_v8 = vadd.f32 %v228_v1, %v227_v61  ;;  %317 = vpow2.f32 %v197_v63  ;;  %v235_v10 = vmul.f32 %v310_v47, %v233_v3  ;;  %v170_v38 = vadd.f32 %v169_v30, %v168_v26 }
  0xe3   :  { %v236_v11 = vsel %vm135_vm2, %v234_v7, 0.0 }
  0xe4   :  { %v312_v12 = vpop.eup %311  ;;  %v230_v13 = vrot.slane %v229_v8, 1  ;;  %v237_v15 = vsel %vm137_vm3, %v235_v10, 0.0  ;;  %v171_v46 = vrot.slane %v170_v38, 2 }
  0xe5   :  { %v314_v17 = vpop.eup %313  ;;  %v152_v18 = vsel %vm135_vm2, %v312_v12, 0.0  ;;  %v238_v6 = vadd.f32 %v237_v15, %v236_v11 }
  0xe6   :  { %v231_v20 = vadd.f32 %v230_v13, %v229_v8  ;;  %v153_v21 = vsel %vm137_vm3, %v314_v17, 0.0  ;;  %v172_v54 = vadd.f32 %v171_v46, %v170_v38  ;;  %v130_v8 = vand.u32 127, %v123_v2 }
  0xe7   :  { %v316_v22 = vpop.eup %315  ;;  %v154_v24 = vadd.f32 %v153_v21, %v152_v18  ;;  %v239_v27 = vrot.slane %v238_v6, 4 }
  0xe8   :  { %v318_v25 = vpop.eup %317  ;;  %319 = vrcp.f32 %v231_v20  ;;  %v199_v4 = vsel %vm135_vm2, %v316_v22, 0.0  ;;  %v256_v52 = vand.u32 2147483648, %v231_v20  ;;  %vm250_vm5 = vweird.f32 %v231_v20 }
  0xe9   :  { %v155_v5 = vrot.slane %v154_v24, 4  ;;  %v200_v16 = vsel %vm137_vm3, %v318_v25, 0.0  ;;  %v240_v33 = vadd.f32 %v239_v27, %v238_v6  ;;  %v254_v53 = vand.u32 2147483647, %v231_v20 }
  0xea   :  { %v201_v28 = vadd.f32 %v200_v16, %v199_v4  ;;  %v257_v57 = vor.u32 1.1754944e-38, %v256_v52  ;;  %v173_v62 = vrot.slane %v172_v54, 1  ;;  %vm134_vm8 = vcmp.lt.s32.totalorder %v130_v8, 8 }
  0xeb   :  { %v156_v29 = vadd.f32 %v155_v5, %v154_v24  ;;  %v241_v41 = vrot.slane %v240_v33, 2  ;;  %vm255_vm7 = vcmp.eq.f32.partialorder %v254_v53, 8.507059e+37 }
  0xec   :  { %v202_v31 = vrot.slane %v201_v28, 4  ;;  %v174_v9 = vadd.f32 %v173_v62, %v172_v54 }
  0xed   :  { %v157_v32 = vrot.slane %v156_v29, 2  ;;  %v242_v48 = vadd.f32 %v241_v41, %v240_v33 }
  0xee   :  { %v320_v34 = vpop.eup %319  ;;  %v203_v35 = vadd.f32 %v202_v31, %v201_v28 }
  0xef   :  { %v158_v36 = vadd.f32 %v157_v32, %v156_v29  ;;  %v246_v37 = vmul.f32 %v320_v34, %v231_v20  ;;  %vm251_vm4 = vweird.f32 %v320_v34  ;;  %v243_v55 = vrot.slane %v242_v48, 1 }
  0xf0   :  { %v204_v39 = vrot.slane %v203_v35, 2  ;;  %vm252_vm6 = vmor %vm250_vm5, %vm251_vm4 }
  0xf1   :  { %v159_v40 = vrot.slane %v158_v36, 1  ;;  %v247_v42 = vsub.f32 1.0, %v246_v37  ;;  %v244_v63 = vadd.f32 %v243_v55, %v242_v48 }
  0xf2   :  { %v205_v43 = vadd.f32 %v204_v39, %v203_v35 }
  0xf3   :  { %v160_v44 = vadd.f32 %v159_v40, %v158_v36  ;;  %v248_v45 = vmul.f32 %v320_v34, %v247_v42 }
  0xf4   :  { %v206_v47 = vrot.slane %v205_v43, 1 }
  0xf5   :  { %321 = vlog2.f32 %v160_v44  ;;  %v249_v50 = vadd.f32 %v320_v34, %v248_v45 }
  0xf6   :  { %v207_v51 = vadd.f32 %v206_v47, %v205_v43  ;;  %323 = vlog2.f32 %v231_v20 }
  0xf7   :  { %v253_v56 = vsel %vm252_vm6, %v320_v34, %v249_v50 }
  0xf8   :  { %325 = vlog2.f32 %v207_v51  ;;  %v258_v60 = vsel %vm255_vm7, %v257_v57, %v253_v56 }
  0xf9   :  { %v259_v3 = vmul.f32 %v258_v60, %v244_v63 }
  0xfb   :  { %v322_v58 = vpop.eup %321 }
  0xfc   :  { %v162_v59 = vmul.f32 0.6931472, %v322_v58  ;;  %v324_v61 = vpop.eup %323 }
  0xfd   :  { %v264_v11 = vmul.f32 0.6931472, %v324_v61 }
  0xfe   :  { %v326_v0 = vpop.eup %325  ;;  %v163_v1 = vadd.f32 %v162_v59, %v497_v49 }
  0xff   :  { %v261_v7 = vmul.f32 0.6931472, %v326_v0 }
 0x100   :  { %v175_v12 = vsub.f32 %v163_v1, %v174_v9 }
 0x101   :  { %v262_v10 = vadd.f32 %v261_v7, %v259_v3 }
 0x103   :  { %v265_v13 = vsub.f32 %v262_v10, %v264_v11 }
 0x105   :  { %v266_v14 = vadd.f32 %v265_v13, %v175_v12 }
 0x107   :  { %v267_v15 = vsel %vm134_vm8, %v266_v14, 0.0 }
 0x108   :  { %v269_v17 = vsel %vm268_vm9, %v267_v15, 0.0 }
 0x109   :  { %270 = vadd.xlane.f32.xlu1 %v269_v17 }
 0x17c   :  { %v271_v18 = vpop.xlane.xlu1 %270 }
 0x17d   :  { %v272_v19 = vrot.slane %v271_v18, 4 }
 0x17f   :  { %v273_v6 = vadd.f32 %v272_v19, %v271_v18 }
 0x181   :  { %v274_v20 = vrot.slane %v273_v6, 2 }
 0x183   :  { %v275_v49 = vadd.f32 %v274_v20, %v273_v6 }
 0x185   :  { %v276_v21 = vrot.slane %v275_v49, 1 }
 0x187   :  { %v277_v22 = vadd.f32 %v276_v21, %v275_v49 }
 0x189   :  { %299 = vpush %v277_v22 }
 0x1ba   :  { %s300_s29 = spop %299 }
 0x1bb   :  { %v279_v2 = vstv %s300_s29 }
 0x1bc   :  { %280 = vst [vmem:[#allocation8] sm:$0x1] %v279_v2 }
 0x1bd   :  { %291 = dma.vmem_to_hbm [thread:$0]  %s287_s28, 16, %s289_s26, [#allocation4]  }
 0x1be   :  { %427 = dma.done.wait [#allocation4], 16  }
 0x1bf   :  { %428 = vsyncadd [#allocation4], 4294967280 }
 0x1c0   :  { %296 = vsyncpa [#allocation3], 1 }
 0x1c1   :  { %297 = vsyncpa [#allocation6], 1 }
 0x1c2   :  { %298 = vsyncpa [#allocation4], 1 }

</bundles_post_ra>
